<compile_context>
chip_gen: v7x
topology: tpu7x:2x2x1
jax: 0.10.0
libtpu: 0.0.40
codegen_flags: <defaults>
</compile_context>

<pallas_src>
import jax
import jax.numpy as jnp
from jax.experimental import pallas as pl
from jax.experimental.pallas import tpu as pltpu


def _round_up(x, m):
    return ((x + m - 1) // m) * m


def _choose_tile(B, cap=2048):
    """Batch tile (lane dim): multiple of 128, divides b_pad, >=2 grid steps
    when the padded batch exceeds one 128-lane tile (v7x megacore)."""
    b128 = _round_up(max(B, 1), 128)
    if b128 <= 128:
        return b128, b128                       # single small tile, grid=(1,)
    tile = min(cap, _round_up((b128 + 1) // 2, 128))
    b_pad = _round_up(B, tile)
    return tile, b_pad


def critic_kernel(xT_ref, w1_ref, b1_ref, w2_ref, b2_ref, w3_ref, b3_ref, o_ref):
    # Layer 1: (H, in_dim) @ (in_dim, tile_b) + (H, 1) -> (H, tile_b), ReLU
    h1 = jnp.dot(w1_ref[...], xT_ref[...],
                 preferred_element_type=jnp.float32) + b1_ref[...]
    h1 = jnp.maximum(h1, 0.0)
    # Layer 2: (H, H) @ (H, tile_b) + (H, 1) -> (H, tile_b), ReLU
    h2 = jnp.dot(w2_ref[...], h1,
                 preferred_element_type=jnp.float32) + b2_ref[...]
    h2 = jnp.maximum(h2, 0.0)
    # Layer 3: (1, H) @ (H, tile_b) -> (1, tile_b) lane-dense row; scalar b3
    # from SMEM.
    q = jnp.dot(w3_ref[...], h2,
                preferred_element_type=jnp.float32) + b3_ref[0, 0]
    o_ref[...] = q.astype(o_ref.dtype)


def critic_forward(state, action, params, *, tile_b=None):
    """state: (B, state_dim), action: (B, action_dim) -> (B, 1)."""
    w1, b1, w2, b2, w3, b3 = params              # PyTorch (out, in) layouts
    B = state.shape[0]
    in_dim = state.shape[1] + action.shape[1]
    H = w1.shape[0]

    # Single fused, transposed input stream: (in_dim, B). Concat/transpose of a
    # (B, in_dim) array in the wrapper is negligible vs. kernel work.
    xT = jnp.concatenate([state, action], axis=-1).T

    if tile_b is None:
        tile_b, b_pad = _choose_tile(B)
    else:
        tile_b = max(128, _round_up(tile_b, 128))
        b_pad = _round_up(B, tile_b)

    if b_pad != B:
        xT = jnp.pad(xT, ((0, 0), (0, b_pad - B)))

    num_tiles = b_pad // tile_b
    resident = lambda i: (0, 0)                  # weights stay in VMEM

    out = pl.pallas_call(
        critic_kernel,
        out_shape=jax.ShapeDtypeStruct((1, b_pad), jnp.float32),
        grid=(num_tiles,),
        in_specs=[
            pl.BlockSpec((in_dim, tile_b), lambda i: (0, i)),   # x^T tile
            pl.BlockSpec((H, in_dim), resident),                # W1
            pl.BlockSpec((H, 1), resident),                     # b1
            pl.BlockSpec((H, H), resident),                     # W2
            pl.BlockSpec((H, 1), resident),                     # b2
            pl.BlockSpec((1, H), resident),                     # W3 row
            pl.BlockSpec((1, 1), resident,
                         memory_space=pltpu.MemorySpace.SMEM),  # b3 scalar
        ],
        out_specs=pl.BlockSpec((1, tile_b), lambda i: (0, i)),  # lane-dense row
        compiler_params=pltpu.CompilerParams(
            dimension_semantics=("parallel",),
        ),
    )(xT, w1, b1, w2, b2, w3, b3)

    # Padded batch columns only ever produce bias-only garbage that is sliced
    # away here; never consume the raw (1, b_pad) row downstream.
    return out[0, :B].reshape(B, 1)


def xavier_uniform(key, shape, dtype=jnp.float32):
    # matches torch.nn.init.xavier_uniform_ (gain=1); shape = (fan_out, fan_in)
    fan_out, fan_in = shape
    limit = (6.0 / (fan_in + fan_out)) ** 0.5
    return jax.random.uniform(key, shape, dtype, minval=-limit, maxval=limit)


def init_critic_params(key, state_dim, action_dim, hidden_dim):
    in_dim = state_dim + action_dim
    k1, k2, k3 = jax.random.split(key, 3)
    w1 = xavier_uniform(k1, (hidden_dim, in_dim))        # (H, in)  torch layout
    b1 = jnp.zeros((hidden_dim, 1), jnp.float32)
    w2 = xavier_uniform(k2, (hidden_dim, hidden_dim))    # (H, H)
    b2 = jnp.zeros((hidden_dim, 1), jnp.float32)
    w3 = xavier_uniform(k3, (1, hidden_dim))             # (1, H)
    b3 = jnp.zeros((1, 1), jnp.float32)
    return (w1, b1, w2, b2, w3, b3)


def critic_reference(state, action, params):
    w1, b1, w2, b2, w3, b3 = params
    x = jnp.concatenate([state, action], axis=-1)
    h1 = jnp.maximum(x @ w1.T + b1.T, 0.0)
    h2 = jnp.maximum(h1 @ w2.T + b2.T, 0.0)
    return h2 @ w3.T + b3


if __name__ == "__main__":
    state_dim, action_dim, hidden_dim = 12, 4, 32
    key = jax.random.PRNGKey(0)
    k_state, k_action, k_params = jax.random.split(key, 3)
    params = init_critic_params(k_params, state_dim, action_dim, hidden_dim)

    # Small batch: single-tile path (grid=(1,), B padded to 128 lanes).
    B = 8
    state = jax.random.normal(k_state, (B, state_dim), jnp.float32)
    action = jax.random.normal(k_action, (B, action_dim), jnp.float32)
    q = jax.block_until_ready(critic_forward(state, action, params))
    q_ref = critic_reference(state, action, params)
    assert q.shape == (B, 1), q.shape
    assert jnp.allclose(q, q_ref, atol=1e-5, rtol=1e-5), (q, q_ref)

    # Larger, unaligned batch: multi-tile path (>=2 grid steps, padding+slice).
    B2 = 300
    state2 = jax.random.normal(k_state, (B2, state_dim), jnp.float32)
    action2 = jax.random.normal(k_action, (B2, action_dim), jnp.float32)
    q2 = jax.block_until_ready(critic_forward(state2, action2, params))
    q2_ref = critic_reference(state2, action2, params)
    assert q2.shape == (B2, 1), q2.shape
    assert jnp.allclose(q2, q2_ref, atol=1e-5, rtol=1e-5)

    print("KERNEL_OK")
</pallas_src>

<mosaic_0001>
module attributes {stable_mosaic.version = 11 : i64} {
  func.func @critic_kernel(%arg0: i32, %arg1: memref<16x128xf32, #tpu.memory_space<vmem>>, %arg2: memref<32x16xf32, #tpu.memory_space<vmem>>, %arg3: memref<32x1xf32, #tpu.memory_space<vmem>>, %arg4: memref<32x32xf32, #tpu.memory_space<vmem>>, %arg5: memref<32x1xf32, #tpu.memory_space<vmem>>, %arg6: memref<1x32xf32, #tpu.memory_space<vmem>>, %arg7: memref<1x1xf32, #tpu.memory_space<smem>>, %arg8: memref<1x128xf32, #tpu.memory_space<vmem>>) attributes {dimension_semantics = [#tpu.dimension_semantics<parallel>], iteration_bounds = array<i64: 1>, scalar_prefetch = 0 : i64, scratch_operands = 0 : i64, tpu.core_type = #tpu.core_type<tc>, window_params = [{transform_indices = @transform_0, window_bounds = array<i64: 16, 128>}, {pipeline_mode = #tpu.pipeline_mode<synchronous>, transform_indices = @transform_1, window_bounds = array<i64: 32, 16>}, {pipeline_mode = #tpu.pipeline_mode<synchronous>, transform_indices = @transform_2, window_bounds = array<i64: 32, 1>}, {pipeline_mode = #tpu.pipeline_mode<synchronous>, transform_indices = @transform_3, window_bounds = array<i64: 32, 32>}, {pipeline_mode = #tpu.pipeline_mode<synchronous>, transform_indices = @transform_4, window_bounds = array<i64: 32, 1>}, {pipeline_mode = #tpu.pipeline_mode<synchronous>, transform_indices = @transform_5, window_bounds = array<i64: 1, 32>}, {transform_indices = @transform_6, window_bounds = array<i64: 1, 1>}, {transform_indices = @transform_7, window_bounds = array<i64: 1, 128>}]} {
    %c0 = arith.constant 0 : index
    %c0_0 = arith.constant 0 : index
    %0 = vector.load %arg2[%c0, %c0_0] : memref<32x16xf32, #tpu.memory_space<vmem>>, vector<32x16xf32>
    %c0_1 = arith.constant 0 : index
    %c0_2 = arith.constant 0 : index
    %1 = vector.load %arg1[%c0_1, %c0_2] : memref<16x128xf32, #tpu.memory_space<vmem>>, vector<16x128xf32>
    %cst = arith.constant dense<0.000000e+00> : vector<32x128xf32>
    %2 = tpu.matmul %0, %1, %cst {dimension_numbers = #tpu.dot_dimension_numbers<[1], [0], [0], [1], [0, 0, 1, 1], [], []>} : vector<32x16xf32>, vector<16x128xf32>, vector<32x128xf32> -> vector<32x128xf32>
    %c0_3 = arith.constant 0 : index
    %c0_4 = arith.constant 0 : index
    %3 = vector.load %arg3[%c0_3, %c0_4] : memref<32x1xf32, #tpu.memory_space<vmem>>, vector<32x1xf32>
    %4 = vector.broadcast %3 : vector<32x1xf32> to vector<32x128xf32>
    %5 = arith.addf %2, %4 : vector<32x128xf32>
    %cst_5 = arith.constant 0.000000e+00 : f32
    %6 = vector.broadcast %cst_5 : f32 to vector<32x128xf32>
    %7 = arith.maximumf %5, %6 : vector<32x128xf32>
    %c0_6 = arith.constant 0 : index
    %c0_7 = arith.constant 0 : index
    %8 = vector.load %arg4[%c0_6, %c0_7] : memref<32x32xf32, #tpu.memory_space<vmem>>, vector<32x32xf32>
    %cst_8 = arith.constant dense<0.000000e+00> : vector<32x128xf32>
    %9 = tpu.matmul %8, %7, %cst_8 {dimension_numbers = #tpu.dot_dimension_numbers<[1], [0], [0], [1], [0, 0, 1, 1], [], []>} : vector<32x32xf32>, vector<32x128xf32>, vector<32x128xf32> -> vector<32x128xf32>
    %c0_9 = arith.constant 0 : index
    %c0_10 = arith.constant 0 : index
    %10 = vector.load %arg5[%c0_9, %c0_10] : memref<32x1xf32, #tpu.memory_space<vmem>>, vector<32x1xf32>
    %11 = vector.broadcast %10 : vector<32x1xf32> to vector<32x128xf32>
    %12 = arith.addf %9, %11 : vector<32x128xf32>
    %cst_11 = arith.constant 0.000000e+00 : f32
    %13 = vector.broadcast %cst_11 : f32 to vector<32x128xf32>
    %14 = arith.maximumf %12, %13 : vector<32x128xf32>
    %c0_12 = arith.constant 0 : index
    %c0_13 = arith.constant 0 : index
    %15 = vector.load %arg6[%c0_12, %c0_13] : memref<1x32xf32, #tpu.memory_space<vmem>>, vector<1x32xf32>
    %cst_14 = arith.constant dense<0.000000e+00> : vector<1x128xf32>
    %16 = tpu.matmul %15, %14, %cst_14 {dimension_numbers = #tpu.dot_dimension_numbers<[1], [0], [0], [1], [0, 0, 1, 1], [], []>} : vector<1x32xf32>, vector<32x128xf32>, vector<1x128xf32> -> vector<1x128xf32>
    %c0_15 = arith.constant 0 : index
    %c0_16 = arith.constant 0 : index
    %17 = memref.load %arg7[%c0_15, %c0_16] : memref<1x1xf32, #tpu.memory_space<smem>>
    %18 = vector.broadcast %17 : f32 to vector<1x128xf32>
    %19 = arith.addf %16, %18 : vector<1x128xf32>
    %c0_17 = arith.constant 0 : index
    %c0_18 = arith.constant 0 : index
    %20 = vector.load %arg8[%c0_17, %c0_18] : memref<1x128xf32, #tpu.memory_space<vmem>>, vector<1x128xf32>
    tpu.vector_store %arg8[%c0_17, %c0_18], %19 {strides = array<i32>} : memref<1x128xf32, #tpu.memory_space<vmem>>, vector<1x128xf32>,
    return
  }
  func.func @transform_0(%arg0: i32) -> (i32, i32) {
    %c0_i32 = arith.constant 0 : i32
    %c0_i32_0 = arith.constant 0 : i32
    return %c0_i32, %arg0 : i32, i32
  }
  func.func @transform_1(%arg0: i32) -> (i32, i32) {
    %c0_i32 = arith.constant 0 : i32
    %c0_i32_0 = arith.constant 0 : i32
    %c0_i32_1 = arith.constant 0 : i32
    return %c0_i32, %c0_i32_0 : i32, i32
  }
  func.func @transform_2(%arg0: i32) -> (i32, i32) {
    %c0_i32 = arith.constant 0 : i32
    %c0_i32_0 = arith.constant 0 : i32
    %c0_i32_1 = arith.constant 0 : i32
    return %c0_i32, %c0_i32_0 : i32, i32
  }
  func.func @transform_3(%arg0: i32) -> (i32, i32) {
    %c0_i32 = arith.constant 0 : i32
    %c0_i32_0 = arith.constant 0 : i32
    %c0_i32_1 = arith.constant 0 : i32
    return %c0_i32, %c0_i32_0 : i32, i32
  }
  func.func @transform_4(%arg0: i32) -> (i32, i32) {
    %c0_i32 = arith.constant 0 : i32
    %c0_i32_0 = arith.constant 0 : i32
    %c0_i32_1 = arith.constant 0 : i32
    return %c0_i32, %c0_i32_0 : i32, i32
  }
  func.func @transform_5(%arg0: i32) -> (i32, i32) {
    %c0_i32 = arith.constant 0 : i32
    %c0_i32_0 = arith.constant 0 : i32
    %c0_i32_1 = arith.constant 0 : i32
    return %c0_i32, %c0_i32_0 : i32, i32
  }
  func.func @transform_6(%arg0: i32) -> (i32, i32) {
    %c0_i32 = arith.constant 0 : i32
    %c0_i32_0 = arith.constant 0 : i32
    %c0_i32_1 = arith.constant 0 : i32
    return %c0_i32, %c0_i32_0 : i32, i32
  }
  func.func @transform_7(%arg0: i32) -> (i32, i32) {
    %c0_i32 = arith.constant 0 : i32
    %c0_i32_0 = arith.constant 0 : i32
    return %c0_i32, %arg0 : i32, i32
  }
}

</mosaic_0001>

<bundles_post_ra>
// kernel: tpu_custom_call.1
= control target key start
LH: loop header
LB: loop body
LE: loop exit
PB: predicated region body
PF: predicated region fallthrough
CT: control target
= control target key end

     0   :  { %vm58_vm0 = vcmask 130048   ;;  %v493_v4 = vmov 0   ;;  %s619_s0 = inlined_call_operand.vmem [shape: f32[16,128], index: 0, kind: input, shape index: {}]   ;;  %s620_s1 = inlined_call_operand.vmem [shape: f32[32,16], index: 1, kind: input, shape index: {}]   ;;  %s621_s2 = inlined_call_operand.vmem [shape: f32[32,1], index: 2, kind: input, shape index: {}]   ;;  %s622_s3 = inlined_call_operand.vmem [shape: f32[32,32], index: 3, kind: input, shape index: {}]   ;;  %s623_s4 = inlined_call_operand.vmem [shape: f32[32,1], index: 4, kind: input, shape index: {}]   ;;  %s624_s5 = inlined_call_operand.vmem [shape: f32[1,32], index: 5, kind: input, shape index: {}]   ;;  %s625_s6 = inlined_call_operand.<no memory space> [shape: f32[1,1], index: 6, kind: input, shape index: {}]   ;;  %s626_s7 = inlined_call_operand.hbm [shape: f32[1,128], index: 7, kind: output, shape index: {}]  }
   0x1   :  { %v32_v0 = vld [vmem:[%s619_s0] sm:$0xff]  ;;  %v33_v1 = vld [vmem:[%s619_s0 + $0x8] sm:$0xff]  ;;  %467 = vset.pattern.permute.xlu0 %v493_v4  ;;  %468 = vset.pattern.permute.xlu1 %v493_v4  ;;  %v36_v6 = vld [vmem:[%s621_s2 + $0x10] sm:$0xff] }
   0x2   :  { %v28_v2 = vld [vmem:[%s620_s1] sm:$0xff]  ;;  %v444_v3 = vpack.c.bf16 %v33_v1, %v32_v0  ;;  %v29_v7 = vld [vmem:[%s620_s1 + $0x8] sm:$0xff]  ;;  %50 = vperm.xlu1 %468, %v36_v6  }
   0x3   :  { %413 = vmatprep.mubr.msk.f32.mxu0 %vm58_vm0, %v28_v2  ;;  %v34_v5 = vld [vmem:[%s621_s2] sm:$0xff]  ;;  %v35_v8 = vld [vmem:[%s621_s2 + $0x8] sm:$0xff] }
   0x4   :  { %445 = vmatprep.subr.bf16.mxu0 %v444_v3  ;;  %40 = vperm.xlu0 %467, %v34_v5  }
   0x5   :  { %447 = vmatpush3.bf16.msra.mxu0 %v444_v3 }
   0x6   :  { %13 = vsyncpa [#allocation4], 0  ;;  %v30_v9 = vld [vmem:[%s620_s1 + $0x10] sm:$0xff]  ;;  %v37_v10 = vld [vmem:[%s621_s2 + $0x18] sm:$0xff]  ;;  %vm188_vm1 = vcmask 261120   ;;  %v494_v38 = vmov 0.0|0.0   ;;  %v292_v59 = vstv %s625_s6 }
   0x7   :  { %v31_v11 = vld [vmem:[%s620_s1 + $0x18] sm:$0xff]  ;;  %55 = vperm.xlu1 %468, %v37_v10   ;;  %v164_v12 = vld [vmem:[%s623_s4] sm:$0xff]  ;;  %v165_v13 = vld [vmem:[%s623_s4 + $0x8] sm:$0xff]  ;;  %456 = vmatprep.subr.bf16.mxu0 %v494_v38  ;;  %vm495_vm2 = vmmov 0   ;;  %v496_v39 = vmov 0.0   ;;  %s497_s12 = smov [#allocation3]  }
   0x8   :  { %414 = vmatmul.mubr.msk.f32.vlgmr.msra.gmra.mrb[0].mxu0 %vm58_vm0, %v29_v7  ;;  %45 = vperm.xlu0 %467, %v35_v8   ;;  %v166_v14 = vld [vmem:[%s623_s4 + $0x10] sm:$0xff]  ;;  %v167_v15 = vld [vmem:[%s623_s4 + $0x18] sm:$0xff]  ;;  %v160_v16 = vld [vmem:[%s622_s3] sm:$0xff]  ;;  %s373_s13 = sshll.u32 %s497_s12, 4  ;;  %s374_s13 = int_to_ptr.vmem [resolvable:$true] %s373_s13 }
   0x9   :  { %416 = vmatprep.mubr.msk.f32.mxu0 %vm58_vm0, %v30_v9  ;;  %427 = vmatprep.mubr.msk.f32.mxu1 %vm188_vm1, %v160_v16  ;;  %v161_v35 = vld [vmem:[%s622_s3 + $0x8] sm:$0xff]  ;;  %v162_v36 = vld [vmem:[%s622_s3 + $0x10] sm:$0xff]  ;;  %v163_v37 = vld [vmem:[%s622_s3 + $0x18] sm:$0xff]  ;;  %s469_s14 = scalar_lea.vmem %s374_s13, 16  ;;  %s473_s15 = scalar_lea.vmem %s374_s13, 32 }
   0xa   :  { %v290_v58 = vld [vmem:[%s624_s5] sm:$0x1]  ;;  %p470_p0 = scmp.ne.s32.totalorder %s374_s13, %s469_s14  ;;  %p474_p1 = scmp.lt.s32.totalorder %s374_s13, %s374_s13 }
   0xb   :  { %175 = vperm.xlu1 %468, %v165_v13   ;;  %p475_p2 = scmp.lt.s32.totalorder %s473_s15, %s469_s14 }
   0xc   :  { %417 = vmatmul.mubr.msk.f32.gmra.mrb[2].mxu0 %vm58_vm0, %v31_v11  ;;  %170 = vperm.xlu0 %467, %v164_v12  }
   0xd   :  { %441 = vmatprep.mubr.msk.f32.mxu0 %vm495_vm2, %v496_v39  ;;  %p476_p3 = por %p475_p2, %p474_p1 }
   0xf   :  { %185 = vperm.xlu1 %468, %v167_v15   ;;  %p477_p4 = pnand %p476_p3, %p470_p0 }
  0x10   :  { %180 = vperm.xlu0 %467, %v166_v14  }
  0x81   :  { %v51_v18 = vpop.permute.xlu1 %50 }
  0x83   :  { %v41_v17 = vpop.permute.xlu0 %40 }
  0x86   :  { %v56_v25 = vpop.permute.xlu1 %55 }
  0x87   :  { %v46_v19 = vpop.permute.xlu0 %45 }
  0x8a   :  { %v176_v40 = vpop.permute.xlu1 %175 }
  0x8b   :  { %v171_v41 = vpop.permute.xlu0 %170 }
  0x8e   :  { %v186_v47 = vpop.permute.xlu1 %185 }
  0x8f   :  { %v181_v50 = vpop.permute.xlu0 %180 }
  0xdb   :  { %v415_v20 = vpop.f32.mrb[0].mxu0 }
  0xdc   :  { %v143_v21 = vadd.f32 %v415_v20, %v46_v19  ;;  %v137_v22 = vpop.f32.mrb[1].mxu0 }
  0xdd   :  { %v138_v23 = vadd.f32 %v137_v22, %v41_v17 }
  0xde   :  { %v157_v24 = vmax.f32 %v143_v21, 0.0 }
  0xdf   :  { %v156_v26 = vmax.f32 %v138_v23, 0.0  ;;  %v418_v27 = vpop.f32.mrb[2].mxu0 }
  0xe0   :  { %v153_v28 = vadd.f32 %v418_v27, %v56_v25  ;;  %v147_v29 = vpop.f32.mrb[3].mxu0 }
  0xe1   :  { %v148_v30 = vadd.f32 %v147_v29, %v51_v18  ;;  %v448_v31 = vpack.c.bf16 %v157_v24, %v156_v26 }
  0xe2   :  { %v159_v32 = vmax.f32 %v153_v28, 0.0 }
  0xe3   :  { %v158_v33 = vmax.f32 %v148_v30, 0.0  ;;  %449 = vmatprep.subr.bf16.mxu1 %v448_v31 }
  0xe4   :  { %451 = vmatpush3.bf16.msra.mxu1 %v448_v31 }
  0xe5   :  { %v452_v34 = vpack.c.bf16 %v159_v32, %v158_v33 }
  0xe7   :  { %453 = vmatprep.subr.bf16.mxu1 %v452_v34 }
  0xe8   :  { %455 = vmatpush3.bf16.msra.mxu1 %v452_v34 }
  0xeb   :  { %428 = vmatmul.mubr.msk.f32.vlgmr.msra.gmra.mrb[0].mxu1 %vm188_vm1, %v161_v35 }
  0xec   :  { %430 = vmatprep.mubr.msk.f32.mxu1 %vm188_vm1, %v162_v36 }
  0xef   :  { %431 = vmatmul.mubr.msk.f32.gmra.mrb[2].mxu1 %vm188_vm1, %v163_v37 }
 0x1be   :  { %v429_v42 = vpop.f32.mrb[0].mxu1 }
 0x1bf   :  { %v273_v43 = vadd.f32 %v429_v42, %v176_v40  ;;  %v267_v44 = vpop.f32.mrb[1].mxu1 }
 0x1c0   :  { %v268_v45 = vadd.f32 %v267_v44, %v171_v41 }
 0x1c1   :  { %v287_v46 = vmax.f32 %v273_v43, 0.0 }
 0x1c2   :  { %v286_v48 = vmax.f32 %v268_v45, 0.0  ;;  %v432_v49 = vpop.f32.mrb[2].mxu1 }
 0x1c3   :  { %v283_v51 = vadd.f32 %v432_v49, %v186_v47  ;;  %v277_v52 = vpop.f32.mrb[3].mxu1 }
 0x1c4   :  { %v457_v53 = vpack.c.bf16 %v287_v46, %v286_v48  ;;  %v278_v54 = vadd.f32 %v277_v52, %v181_v50 }
 0x1c5   :  { %v289_v55 = vmax.f32 %v283_v51, 0.0 }
 0x1c6   :  { %v288_v56 = vmax.f32 %v278_v54, 0.0  ;;  %458 = vmatpush3.bf16.msra.mxu0 %v457_v53 }
 0x1c7   :  { %459 = vmatprep.subr.bf16.mxu0 %v494_v38 }
 0x1c8   :  { %v460_v57 = vpack.c.bf16 %v289_v55, %v288_v56 }
 0x1ca   :  { %461 = vmatpush3.bf16.msra.mxu0 %v460_v57 }
 0x1cd   :  { %442 = vmatmul.mubr.msk.f32.vlgmr.msra.gmra.mrb[4].mxu0 %vm188_vm1, %v290_v58 }
 0x2a0   :  { %v362_v60 = vpop.f32.mrb[4].mxu0 }
 0x2a1   :  { %v363_v61 = vadd.f32 %v362_v60, %v292_v59  ;;  %v443_v62 = vpop.f32.mrb[5].mxu0 }
 0x2a3   :  { %366 = vst [vmem:[#allocation3] sm:$0x1] %v363_v61 }
 0x2a4   :  { %480 = shalt.err (!%p477_p4)
}
 0x2a5   :  { %s481_s17 = scalar_lea.hbm %s626_s7, 16 }
 0x2a6   :  { %p482_p5 = scmp.ne.s32.totalorder %s626_s7, %s481_s17  ;;  %p485_p6 = scmp.lt.u32.totalorder %s481_s17, %s626_s7 }
 0x2a8   :  { %p487_p7 = pnand %p485_p6, %p482_p5 }
 0x2aa   :  { %490 = shalt.err (!%p487_p7)
}
 0x2ab   :  { %376 = dma.vmem_to_hbm [thread:$0]  %s374_s13, 16, %s626_s7, [#allocation4]  }
 0x2ac   :  { %491 = dma.done.wait [#allocation4], 16  }
 0x2ad   :  { %492 = vsyncadd [#allocation4], 4294967280 }
 0x2ae   :  { %380 = vsyncpa [#allocation4], 1 }

</bundles_post_ra>
